<compile_context>
chip_gen: v6e
topology: v6e:2x2x1
jax: 0.10.0
libtpu: 0.0.40
codegen_flags: <defaults>
</compile_context>

<pallas_src>
import jax
import jax.numpy as jnp
from jax import lax
from jax.experimental import pallas as pl
from jax.experimental.pallas import tpu as pltpu

BETA = 0.001


def _round_up(x, m):
    return ((x + m - 1) // m) * m


# ----------------------------------------------------------------------------------
# shared per-block forward
# ----------------------------------------------------------------------------------
def _forward_block(x_ref, we_ref, be_ref, wh_ref, bh_ref, wd_ref, bd_ref,
                   sp_ref, eps_ref, cd, cdp):
    # encoder Linear(in_dim -> m_dim) + ReLU   (bf16 x bf16 -> f32 accumulate)
    h = jnp.dot(x_ref[...], we_ref[...],
                preferred_element_type=jnp.float32) + be_ref[...]
    h = jnp.maximum(h, 0.0)

    # fused, lane-padded mu/std heads: ONE matmul -> (blk, 2*cdp).
    # Slices below are 128-lane-tile aligned (no sub-tile lane extraction).
    heads = jnp.dot(h.astype(jnp.bfloat16), wh_ref[...],
                    preferred_element_type=jnp.float32) + bh_ref[...]
    mu = heads[:, :cdp]                    # padded lanes are exactly 0
    pre = heads[:, cdp:] - 5.0

    # numerically stable softplus(pre)
    std = jnp.maximum(pre, 0.0) + jnp.log1p(jnp.exp(-jnp.abs(pre)))

    # widen eps (blk, cd) bf16 -> (blk, cdp) f32 with an exact 0/1 spread matmul
    # (keeps eps streamed at its narrow bf16 width; padded lanes become 0).
    eps_pad = jnp.dot(eps_ref[...], sp_ref[...],
                      preferred_element_type=jnp.float32)

    # reparameterise; padded lanes: mu = 0, eps = 0 -> z = 0 exactly
    z = mu + std * eps_pad

    # decoder Linear(cd -> 1) as VPU multiply + lane reduce (w_dec zero-padded)
    out = jnp.sum(z * wd_ref[...], axis=-1, keepdims=True) + bd_ref[...]

    # lane-dense output slab: z in lanes [0, cd), `out` parked in lane cd
    lane = lax.broadcasted_iota(jnp.int32, (1, cdp), 1)
    slab = jnp.where(lane == cd, out, z)
    return slab, out, mu, std


# ----------------------------------------------------------------------------------
# kernels
# ----------------------------------------------------------------------------------
def _make_loss_kernel(cd, cdp, blk, b_actual):
    need_row_mask = (b_actual % blk) != 0

    def kernel(x_ref, we_ref, be_ref, wh_ref, bh_ref, wd_ref, bd_ref, sp_ref,
               eps_ref, y_ref, slab_ref, part_ref):
        slab, out, mu, std = _forward_block(x_ref, we_ref, be_ref, wh_ref,
                                            bh_ref, wd_ref, bd_ref, sp_ref,
                                            eps_ref, cd, cdp)
        slab_ref[...] = slab

        # per-block partial sums (means finalized in the wrapper)
        lane = lax.broadcasted_iota(jnp.int32, (1, cdp), 1)
        lane_ok = lane < cd
        safe_std = jnp.maximum(std, 1e-30)          # insurance against log(0)
        kl_terms = mu * mu + std * std - 2.0 * jnp.log(safe_std) - 1.0
        ce_terms = jnp.abs(out - y_ref[...])

        if need_row_mask:                            # mask padded batch rows
            row = (pl.program_id(0) * blk
                   + lax.broadcasted_iota(jnp.int32, (blk, 1), 0))
            row_ok = row < b_actual
            kl_terms = jnp.where(row_ok & lane_ok, kl_terms, 0.0)
            ce_terms = jnp.where(row_ok, ce_terms, 0.0)
        else:
            kl_terms = jnp.where(lane_ok, kl_terms, 0.0)

        ce_p = jnp.sum(ce_terms)
        kl_p = jnp.sum(kl_terms)

        # (1, 8, 128) partial tile: CE in [0,0,0], KL in [0,0,1], zeros elsewhere
        sub = lax.broadcasted_iota(jnp.int32, (1, 8, 128), 1)
        ln = lax.broadcasted_iota(jnp.int32, (1, 8, 128), 2)
        part_ref[...] = jnp.where((sub == 0) & (ln == 0), ce_p,
                                  jnp.where((sub == 0) & (ln == 1), kl_p, 0.0))

    return kernel


def _make_fwd_kernel(cd, cdp):
    def kernel(x_ref, we_ref, be_ref, wh_ref, bh_ref, wd_ref, bd_ref, sp_ref,
               eps_ref, slab_ref):
        slab, _, _, _ = _forward_block(x_ref, we_ref, be_ref, wh_ref, bh_ref,
                                       wd_ref, bd_ref, sp_ref, eps_ref, cd, cdp)
        slab_ref[...] = slab

    return kernel


# ----------------------------------------------------------------------------------
# VMEM-aware batch tiling
# ----------------------------------------------------------------------------------
def _vmem_budget_and_limit():
    vmem_cap = 128 << 20
    try:
        vmem_cap = int(pltpu.get_tpu_info().vmem_capacity_bytes)
    except Exception:
        pass
    budget = min((vmem_cap * 2) // 5, 56 << 20)     # ~25 MiB v7x, ~51-56 MiB v5e/v6e
    limit = int(min((vmem_cap * 3) // 4, budget + (24 << 20)))
    return budget, limit


def _select_block_b(B, in_dim, m_dim, cd, cdp, vmem_budget):
    # approximate per-row VMEM bytes: double-buffered streams + f32 intermediates
    per_row = (2 * in_dim * 2          # x (bf16, double-buffered)
               + 2 * cd * 2            # eps (bf16, double-buffered)
               + 2 * 128 * 4           # y (lane-padded in VMEM, double-buffered)
               + 2 * cdp * 4           # z/out slab (f32, double-buffered)
               + m_dim * 6             # encoder activation f32 + bf16 copy
               + 10 * cdp * 4)         # heads / mu / std / z / elementwise temps
    weight_bytes = (in_dim * m_dim * 2 + m_dim * 2 * cdp * 2 + cd * cdp * 2
                    + 8 * 4 * (m_dim + 3 * cdp + 128))
    blk = (vmem_budget - weight_bytes) // per_row
    blk = int(max(8, min(blk, 2048)))
    if B <= blk:
        return _round_up(B, 8)                       # single block, no waste
    return (blk // 256) * 256 if blk >= 256 else (blk // 8) * 8


# ----------------------------------------------------------------------------------
# wrapper
# ----------------------------------------------------------------------------------
def mib_forward(x, params, eps, label_ids=None):
    """Fused mib forward. Returns (z, output, loss) matching the torch module."""
    B, in_dim = x.shape
    m_dim = params["w_enc"].shape[1]
    cd = params["w_mu"].shape[1]
    cdp = _round_up(cd + 1, 128)     # padded head width; lane `cd` stays free for `out`

    # ---- wrapper-side packing / padding / quantization -----------------------------
    def pad_cols(a, w):
        return jnp.pad(a, ((0, 0), (0, w - a.shape[1])))

    x_bf = x.astype(jnp.bfloat16)
    w_enc = params["w_enc"].astype(jnp.bfloat16)
    b_enc = params["b_enc"].reshape(1, m_dim).astype(jnp.float32)
    w_heads = jnp.concatenate(
        [pad_cols(params["w_mu"], cdp), pad_cols(params["w_std"], cdp)],
        axis=1).astype(jnp.bfloat16)                              # (m_dim, 2*cdp)
    b_heads = jnp.concatenate(
        [pad_cols(params["b_mu"].reshape(1, -1), cdp),
         pad_cols(params["b_std"].reshape(1, -1), cdp)],
        axis=1).astype(jnp.float32)                               # (1, 2*cdp)
    w_dec = pad_cols(params["w_dec"].reshape(1, cd), cdp).astype(jnp.float32)
    b_dec = params["b_dec"].reshape(1, 1).astype(jnp.float32)
    spread = jnp.eye(cd, cdp, dtype=jnp.bfloat16)                 # exact 0/1 widener
    eps_bf = eps.astype(jnp.bfloat16)                             # halve eps DMA bytes

    budget, vmem_limit = _vmem_budget_and_limit()
    blk = _select_block_b(B, in_dim, m_dim, cd, cdp, budget)
    B_pad = _round_up(B, blk)
    grid = (B_pad // blk,)
    if B_pad != B:
        x_bf = jnp.pad(x_bf, ((0, B_pad - B), (0, 0)))
        eps_bf = jnp.pad(eps_bf, ((0, B_pad - B), (0, 0)))

    const2 = lambda i: (0, 0)
    batch = lambda i: (i, 0)
    buf1 = pl.Buffered(1)            # grid-invariant weights: single-buffer them
    w_specs = [
        pl.BlockSpec((in_dim, m_dim), const2, pipeline_mode=buf1),    # w_enc
        pl.BlockSpec((1, m_dim), const2, pipeline_mode=buf1),         # b_enc
        pl.BlockSpec((m_dim, 2 * cdp), const2, pipeline_mode=buf1),   # w_heads
        pl.BlockSpec((1, 2 * cdp), const2, pipeline_mode=buf1),       # b_heads
        pl.BlockSpec((1, cdp), const2, pipeline_mode=buf1),           # w_dec
        pl.BlockSpec((1, 1), const2, pipeline_mode=buf1),             # b_dec
        pl.BlockSpec((cd, cdp), const2, pipeline_mode=buf1),          # spread
    ]
    x_spec = pl.BlockSpec((blk, in_dim), batch)
    eps_spec = pl.BlockSpec((blk, cd), batch)
    slab_spec = pl.BlockSpec((blk, cdp), batch)
    cparams = pltpu.CompilerParams(dimension_semantics=("parallel",),
                                   vmem_limit_bytes=vmem_limit)
    weight_args = (w_enc, b_enc, w_heads, b_heads, w_dec, b_dec, spread)

    if label_ids is None:
        slab = pl.pallas_call(
            _make_fwd_kernel(cd, cdp),
            grid=grid,
            out_shape=jax.ShapeDtypeStruct((B_pad, cdp), jnp.float32),
            in_specs=[x_spec] + w_specs + [eps_spec],
            out_specs=slab_spec,
            compiler_params=cparams,
        )(x_bf, *weight_args, eps_bf)
        return slab[:B, :cd], slab[:B, cd:cd + 1], 0.0

    y = label_ids.reshape(B, 1).astype(jnp.float32)
    if B_pad != B:
        y = jnp.pad(y, ((0, B_pad - B), (0, 0)))

    slab, parts = pl.pallas_call(
        _make_loss_kernel(cd, cdp, blk, B),
        grid=grid,
        out_shape=(jax.ShapeDtypeStruct((B_pad, cdp), jnp.float32),
                   jax.ShapeDtypeStruct((grid[0], 8, 128), jnp.float32)),
        in_specs=[x_spec] + w_specs + [eps_spec, pl.BlockSpec((blk, 1), batch)],
        out_specs=(slab_spec,
                   pl.BlockSpec((1, 8, 128), lambda i: (i, 0, 0))),
        compiler_params=cparams,
    )(x_bf, *weight_args, eps_bf, y)

    ce = jnp.sum(parts[:, 0, 0]) / B
    kl = 0.5 * jnp.sum(parts[:, 0, 1]) / (B * cd)
    loss = BETA * kl + ce
    return slab[:B, :cd], slab[:B, cd:cd + 1], loss


# ----------------------------------------------------------------------------------
# params + plain-JAX reference (same bf16 quantization as the kernel)
# ----------------------------------------------------------------------------------
def init_params(key, in_dim, compressed_dim, m_dim):
    ks = jax.random.split(key, 8)

    def lin(kw, kb, fan_in, fan_out):
        bound = 1.0 / jnp.sqrt(float(fan_in))
        w = jax.random.uniform(kw, (fan_in, fan_out), jnp.float32, -bound, bound)
        b = jax.random.uniform(kb, (1, fan_out), jnp.float32, -bound, bound)
        return w, b

    w_enc, b_enc = lin(ks[0], ks[1], in_dim, m_dim)
    w_mu, b_mu = lin(ks[2], ks[3], m_dim, compressed_dim)
    w_std, b_std = lin(ks[4], ks[5], m_dim, compressed_dim)
    w_dec, b_dec = lin(ks[6], ks[7], compressed_dim, 1)
    return dict(w_enc=w_enc, b_enc=b_enc, w_mu=w_mu, b_mu=b_mu,
                w_std=w_std, b_std=b_std, w_dec=w_dec, b_dec=b_dec)


def _reference(x, params, eps, label_ids, cd):
    xb = x.astype(jnp.bfloat16)
    web = params["w_enc"].astype(jnp.bfloat16)
    h = jnp.maximum(jnp.dot(xb, web, preferred_element_type=jnp.float32)
                    + params["b_enc"].reshape(1, -1), 0.0)
    whb = jnp.concatenate([params["w_mu"], params["w_std"]], axis=1).astype(jnp.bfloat16)
    bh = jnp.concatenate([params["b_mu"].reshape(1, -1),
                          params["b_std"].reshape(1, -1)], axis=1)
    heads = jnp.dot(h.astype(jnp.bfloat16), whb,
                    preferred_element_type=jnp.float32) + bh
    mu = heads[:, :cd]
    std = jax.nn.softplus(heads[:, cd:] - 5.0)
    eps_q = eps.astype(jnp.bfloat16).astype(jnp.float32)
    z = mu + std * eps_q
    out = z @ params["w_dec"].reshape(cd, 1) + params["b_dec"].reshape(1, 1)
    loss = None
    if label_ids is not None:
        ce = jnp.mean(jnp.abs(out.reshape(-1) - label_ids.reshape(-1)))
        kl = 0.5 * jnp.mean(mu ** 2 + std ** 2 - 2.0 * jnp.log(std) - 1.0)
        loss = BETA * kl + ce
    return z, out, loss


# ----------------------------------------------------------------------------------
# self-test
# ----------------------------------------------------------------------------------
if __name__ == "__main__":
    B, IN_DIM, CD, M_DIM = 8, 128, 32, 128

    key = jax.random.PRNGKey(0)
    k_x, k_p, k_e, k_y = jax.random.split(key, 4)

    x = jax.random.normal(k_x, (B, IN_DIM), jnp.float32)
    params = init_params(k_p, IN_DIM, CD, M_DIM)
    eps = jax.random.normal(k_e, (B, CD), jnp.float32)
    y = jax.random.normal(k_y, (B,), jnp.float32)

    z, out, loss = mib_forward(x, params, eps, y)
    z_nl, out_nl, loss_nl = mib_forward(x, params, eps, None)
    jax.block_until_ready((z, out, loss, z_nl, out_nl))

    z_r, out_r, loss_r = _reference(x, params, eps, y, CD)
    assert z.shape == (B, CD) and out.shape == (B, 1)
    assert jnp.allclose(z, z_r, atol=2e-2, rtol=2e-2)
    assert jnp.allclose(out, out_r, atol=2e-2, rtol=2e-2)
    assert jnp.allclose(loss, loss_r, atol=1e-2, rtol=1e-2)
    assert jnp.allclose(z_nl, z, atol=1e-6) and jnp.allclose(out_nl, out, atol=1e-6)
    assert loss_nl == 0.0

    # ragged batch exercises the pad-to-tile + row-masked loss path
    B2 = 13
    x2 = jax.random.normal(k_x, (B2, IN_DIM), jnp.float32)
    eps2 = jax.random.normal(k_e, (B2, CD), jnp.float32)
    y2 = jax.random.normal(k_y, (B2,), jnp.float32)
    z2, out2, loss2 = mib_forward(x2, params, eps2, y2)
    jax.block_until_ready((z2, out2, loss2))
    z2_r, out2_r, loss2_r = _reference(x2, params, eps2, y2, CD)
    assert z2.shape == (B2, CD) and out2.shape == (B2, 1)
    assert jnp.allclose(z2, z2_r, atol=2e-2, rtol=2e-2)
    assert jnp.allclose(out2, out2_r, atol=2e-2, rtol=2e-2)
    assert jnp.allclose(loss2, loss2_r, atol=1e-2, rtol=1e-2)

    print("KERNEL_OK")
</pallas_src>

<mosaic_0001>
module attributes {stable_mosaic.version = 11 : i64} {
  func.func @kernel(%arg0: i32, %arg1: memref<8x128xbf16, #tpu.memory_space<vmem>>, %arg2: memref<128x128xbf16, #tpu.memory_space<vmem>>, %arg3: memref<1x128xf32, #tpu.memory_space<vmem>>, %arg4: memref<128x256xbf16, #tpu.memory_space<vmem>>, %arg5: memref<1x256xf32, #tpu.memory_space<vmem>>, %arg6: memref<1x128xf32, #tpu.memory_space<vmem>>, %arg7: memref<1x1xf32, #tpu.memory_space<vmem>>, %arg8: memref<32x128xbf16, #tpu.memory_space<vmem>>, %arg9: memref<8x32xbf16, #tpu.memory_space<vmem>>, %arg10: memref<8x1xf32, #tpu.memory_space<vmem>>, %arg11: memref<8x128xf32, #tpu.memory_space<vmem>>, %arg12: memref<1x8x128xf32, #tpu.memory_space<vmem>>) attributes {dimension_semantics = [#tpu.dimension_semantics<parallel>], iteration_bounds = array<i64: 1>, scalar_prefetch = 0 : i64, scratch_operands = 0 : i64, tpu.core_type = #tpu.core_type<tc>, window_params = [{transform_indices = @transform_0, window_bounds = array<i64: 8, 128>}, {pipeline_mode = #tpu.pipeline_mode<synchronous>, transform_indices = @transform_1, window_bounds = array<i64: 128, 128>}, {pipeline_mode = #tpu.pipeline_mode<synchronous>, transform_indices = @transform_2, window_bounds = array<i64: 1, 128>}, {pipeline_mode = #tpu.pipeline_mode<synchronous>, transform_indices = @transform_3, window_bounds = array<i64: 128, 256>}, {pipeline_mode = #tpu.pipeline_mode<synchronous>, transform_indices = @transform_4, window_bounds = array<i64: 1, 256>}, {pipeline_mode = #tpu.pipeline_mode<synchronous>, transform_indices = @transform_5, window_bounds = array<i64: 1, 128>}, {pipeline_mode = #tpu.pipeline_mode<synchronous>, transform_indices = @transform_6, window_bounds = array<i64: 1, 1>}, {pipeline_mode = #tpu.pipeline_mode<synchronous>, transform_indices = @transform_7, window_bounds = array<i64: 32, 128>}, {transform_indices = @transform_8, window_bounds = array<i64: 8, 32>}, {transform_indices = @transform_9, window_bounds = array<i64: 8, 1>}, {transform_indices = @transform_10, window_bounds = array<i64: 8, 128>}, {transform_indices = @transform_11, window_bounds = array<i64: 1, 8, 128>}]} {
    %c0 = arith.constant 0 : index
    %c0_0 = arith.constant 0 : index
    %0 = vector.load %arg1[%c0, %c0_0] : memref<8x128xbf16, #tpu.memory_space<vmem>>, vector<8x128xbf16>
    %c0_1 = arith.constant 0 : index
    %c0_2 = arith.constant 0 : index
    %1 = vector.load %arg2[%c0_1, %c0_2] : memref<128x128xbf16, #tpu.memory_space<vmem>>, vector<128x128xbf16>
    %cst = arith.constant dense<0.000000e+00> : vector<8x128xf32>
    %2 = tpu.matmul %0, %1, %cst {dimension_numbers = #tpu.dot_dimension_numbers<[1], [0], [0], [1], [0, 0, 1, 1], [], []>} : vector<8x128xbf16>, vector<128x128xbf16>, vector<8x128xf32> -> vector<8x128xf32>
    %c0_3 = arith.constant 0 : index
    %c0_4 = arith.constant 0 : index
    %3 = vector.load %arg3[%c0_3, %c0_4] : memref<1x128xf32, #tpu.memory_space<vmem>>, vector<1x128xf32>
    %4 = vector.broadcast %3 : vector<1x128xf32> to vector<8x128xf32>
    %5 = arith.addf %2, %4 : vector<8x128xf32>
    %cst_5 = arith.constant 0.000000e+00 : f32
    %6 = vector.broadcast %cst_5 : f32 to vector<8x128xf32>
    %7 = arith.maximumf %5, %6 : vector<8x128xf32>
    %8 = arith.truncf %7 : vector<8x128xf32> to vector<8x128xbf16>
    %c0_6 = arith.constant 0 : index
    %c0_7 = arith.constant 0 : index
    %9 = vector.load %arg4[%c0_6, %c0_7] : memref<128x256xbf16, #tpu.memory_space<vmem>>, vector<128x256xbf16>
    %cst_8 = arith.constant dense<0.000000e+00> : vector<8x256xf32>
    %10 = tpu.matmul %8, %9, %cst_8 {dimension_numbers = #tpu.dot_dimension_numbers<[1], [0], [0], [1], [0, 0, 1, 1], [], []>} : vector<8x128xbf16>, vector<128x256xbf16>, vector<8x256xf32> -> vector<8x256xf32>
    %c0_9 = arith.constant 0 : index
    %c0_10 = arith.constant 0 : index
    %11 = vector.load %arg5[%c0_9, %c0_10] : memref<1x256xf32, #tpu.memory_space<vmem>>, vector<1x256xf32>
    %12 = vector.broadcast %11 : vector<1x256xf32> to vector<8x256xf32>
    %13 = arith.addf %10, %12 : vector<8x256xf32>
    %14 = vector.extract_strided_slice %13 {offsets = [0, 0], sizes = [8, 128], strides = [1, 1]} : vector<8x256xf32> to vector<8x128xf32>
    %15 = vector.extract_strided_slice %13 {offsets = [0, 128], sizes = [8, 128], strides = [1, 1]} : vector<8x256xf32> to vector<8x128xf32>
    %cst_11 = arith.constant 5.000000e+00 : f32
    %16 = vector.broadcast %cst_11 : f32 to vector<8x128xf32>
    %17 = arith.subf %15, %16 : vector<8x128xf32>
    %cst_12 = arith.constant 0.000000e+00 : f32
    %18 = vector.broadcast %cst_12 : f32 to vector<8x128xf32>
    %19 = arith.maximumf %17, %18 : vector<8x128xf32>
    %20 = math.absf %17 : vector<8x128xf32>
    %cst_13 = arith.constant 0.000000e+00 : f32
    %21 = vector.broadcast %cst_13 : f32 to vector<8x128xf32>
    %22 = arith.subf %21, %20 : vector<8x128xf32>
    %23 = math.exp %22 : vector<8x128xf32>
    %24 = math.log1p %23 : vector<8x128xf32>
    %25 = arith.addf %19, %24 : vector<8x128xf32>
    %c0_14 = arith.constant 0 : index
    %c0_15 = arith.constant 0 : index
    %26 = vector.load %arg9[%c0_14, %c0_15] : memref<8x32xbf16, #tpu.memory_space<vmem>>, vector<8x32xbf16>
    %c0_16 = arith.constant 0 : index
    %c0_17 = arith.constant 0 : index
    %27 = vector.load %arg8[%c0_16, %c0_17] : memref<32x128xbf16, #tpu.memory_space<vmem>>, vector<32x128xbf16>
    %cst_18 = arith.constant dense<0.000000e+00> : vector<8x128xf32>
    %28 = tpu.matmul %26, %27, %cst_18 {dimension_numbers = #tpu.dot_dimension_numbers<[1], [0], [0], [1], [0, 0, 1, 1], [], []>} : vector<8x32xbf16>, vector<32x128xbf16>, vector<8x128xf32> -> vector<8x128xf32>
    %29 = arith.mulf %25, %28 : vector<8x128xf32>
    %30 = arith.addf %14, %29 : vector<8x128xf32>
    %c0_19 = arith.constant 0 : index
    %c0_20 = arith.constant 0 : index
    %31 = vector.load %arg6[%c0_19, %c0_20] : memref<1x128xf32, #tpu.memory_space<vmem>>, vector<1x128xf32>
    %32 = vector.broadcast %31 : vector<1x128xf32> to vector<8x128xf32>
    %33 = arith.mulf %30, %32 : vector<8x128xf32>
    %cst_21 = arith.constant dense<0.000000e+00> : vector<8xf32>
    %34 = vector.multi_reduction <add>, %33, %cst_21 [1] : vector<8x128xf32> to vector<8xf32>
    %35 = vector.shape_cast %34 : vector<8xf32> to vector<8x1xf32>
    %c0_22 = arith.constant 0 : index
    %c0_23 = arith.constant 0 : index
    %36 = vector.load %arg7[%c0_22, %c0_23] : memref<1x1xf32, #tpu.memory_space<vmem>>, vector<1x1xf32>
    %37 = vector.broadcast %36 : vector<1x1xf32> to vector<8x1xf32>
    %38 = arith.addf %35, %37 : vector<8x1xf32>
    %39 = tpu.iota {dimensions = array<i32: 1>} : vector<1x128xi32>
    %c32_i32 = arith.constant 32 : i32
    %40 = vector.broadcast %c32_i32 : i32 to vector<1x128xi32>
    %41 = arith.cmpi eq, %39, %40 : vector<1x128xi32>
    %42 = vector.shape_cast %41 : vector<1x128xi1> to vector<1x128xi1>
    %43 = vector.broadcast %42 : vector<1x128xi1> to vector<8x128xi1>
    %44 = vector.shape_cast %38 : vector<8x1xf32> to vector<8x1xf32>
    %45 = vector.broadcast %44 : vector<8x1xf32> to vector<8x128xf32>
    %46 = arith.select %43, %45, %30 : vector<8x128xi1>, vector<8x128xf32>
    %c0_24 = arith.constant 0 : index
    %c0_25 = arith.constant 0 : index
    %47 = vector.load %arg11[%c0_24, %c0_25] : memref<8x128xf32, #tpu.memory_space<vmem>>, vector<8x128xf32>
    tpu.vector_store %arg11[%c0_24, %c0_25], %46 {strides = array<i32>} : memref<8x128xf32, #tpu.memory_space<vmem>>, vector<8x128xf32>,
    %48 = tpu.iota {dimensions = array<i32: 1>} : vector<1x128xi32>
    %c32_i32_26 = arith.constant 32 : i32
    %49 = vector.broadcast %c32_i32_26 : i32 to vector<1x128xi32>
    %50 = arith.cmpi slt, %48, %49 : vector<1x128xi32>
    %cst_27 = arith.constant 1.000000e-30 : f32
    %51 = vector.broadcast %cst_27 : f32 to vector<8x128xf32>
    %52 = arith.maximumf %25, %51 : vector<8x128xf32>
    %53 = arith.mulf %14, %14 : vector<8x128xf32>
    %54 = arith.mulf %25, %25 : vector<8x128xf32>
    %55 = arith.addf %53, %54 : vector<8x128xf32>
    %56 = math.log %52 : vector<8x128xf32>
    %cst_28 = arith.constant 2.000000e+00 : f32
    %57 = vector.broadcast %cst_28 : f32 to vector<8x128xf32>
    %58 = arith.mulf %57, %56 : vector<8x128xf32>
    %59 = arith.subf %55, %58 : vector<8x128xf32>
    %cst_29 = arith.constant 1.000000e+00 : f32
    %60 = vector.broadcast %cst_29 : f32 to vector<8x128xf32>
    %61 = arith.subf %59, %60 : vector<8x128xf32>
    %c0_30 = arith.constant 0 : index
    %c0_31 = arith.constant 0 : index
    %62 = vector.load %arg10[%c0_30, %c0_31] : memref<8x1xf32, #tpu.memory_space<vmem>>, vector<8x1xf32>
    %63 = arith.subf %38, %62 : vector<8x1xf32>
    %64 = math.absf %63 : vector<8x1xf32>
    %cst_32 = arith.constant 0.000000e+00 : f32
    %65 = vector.shape_cast %50 : vector<1x128xi1> to vector<1x128xi1>
    %66 = vector.broadcast %65 : vector<1x128xi1> to vector<8x128xi1>
    %67 = vector.broadcast %cst_32 : f32 to vector<8x128xf32>
    %68 = arith.select %66, %61, %67 : vector<8x128xi1>, vector<8x128xf32>
    %69 = vector.shape_cast %64 : vector<8x1xf32> to vector<1x8x1xf32>
    %cst_33 = arith.constant dense<0.000000e+00> : vector<1xf32>
    %70 = vector.multi_reduction <add>, %69, %cst_33 [1, 2] : vector<1x8x1xf32> to vector<1xf32>
    %71 = vector.shape_cast %70 : vector<1xf32> to vector<1x1x1xf32>
    %72 = vector.extract %71[0, 0, 0] : f32 from vector<1x1x1xf32>
    %73 = vector.shape_cast %68 : vector<8x128xf32> to vector<1x8x128xf32>
    %cst_34 = arith.constant dense<0.000000e+00> : vector<1xf32>
    %74 = vector.multi_reduction <add>, %73, %cst_34 [1, 2] : vector<1x8x128xf32> to vector<1xf32>
    %75 = vector.shape_cast %74 : vector<1xf32> to vector<1x1x1xf32>
    %76 = vector.extract %75[0, 0, 0] : f32 from vector<1x1x1xf32>
    %77 = tpu.iota {dimensions = array<i32: 1>} : vector<1x8x128xi32>
    %78 = tpu.iota {dimensions = array<i32: 2>} : vector<1x8x128xi32>
    %c0_i32 = arith.constant 0 : i32
    %79 = vector.broadcast %c0_i32 : i32 to vector<1x8x128xi32>
    %80 = arith.cmpi eq, %77, %79 : vector<1x8x128xi32>
    %c0_i32_35 = arith.constant 0 : i32
    %81 = vector.broadcast %c0_i32_35 : i32 to vector<1x8x128xi32>
    %82 = arith.cmpi eq, %78, %81 : vector<1x8x128xi32>
    %83 = arith.andi %80, %82 : vector<1x8x128xi1>
    %c0_i32_36 = arith.constant 0 : i32
    %84 = vector.broadcast %c0_i32_36 : i32 to vector<1x8x128xi32>
    %85 = arith.cmpi eq, %77, %84 : vector<1x8x128xi32>
    %c1_i32 = arith.constant 1 : i32
    %86 = vector.broadcast %c1_i32 : i32 to vector<1x8x128xi32>
    %87 = arith.cmpi eq, %78, %86 : vector<1x8x128xi32>
    %88 = arith.andi %85, %87 : vector<1x8x128xi1>
    %cst_37 = arith.constant 0.000000e+00 : f32
    %89 = vector.broadcast %76 : f32 to vector<1x8x128xf32>
    %90 = vector.broadcast %cst_37 : f32 to vector<1x8x128xf32>
    %91 = arith.select %88, %89, %90 : vector<1x8x128xi1>, vector<1x8x128xf32>
    %92 = vector.broadcast %72 : f32 to vector<1x8x128xf32>
    %93 = arith.select %83, %92, %91 : vector<1x8x128xi1>, vector<1x8x128xf32>
    %c0_38 = arith.constant 0 : index
    %c0_39 = arith.constant 0 : index
    %c0_40 = arith.constant 0 : index
    %94 = vector.load %arg12[%c0_38, %c0_39, %c0_40] : memref<1x8x128xf32, #tpu.memory_space<vmem>>, vector<1x8x128xf32>
    tpu.vector_store %arg12[%c0_38, %c0_39, %c0_40], %93 {strides = array<i32>} : memref<1x8x128xf32, #tpu.memory_space<vmem>>, vector<1x8x128xf32>,
    return
  }
  func.func @transform_0(%arg0: i32) -> (i32, i32) {
    %c0_i32 = arith.constant 0 : i32
    %c0_i32_0 = arith.constant 0 : i32
    return %arg0, %c0_i32 : i32, i32
  }
  func.func @transform_1(%arg0: i32) -> (i32, i32) {
    %c0_i32 = arith.constant 0 : i32
    %c0_i32_0 = arith.constant 0 : i32
    %c0_i32_1 = arith.constant 0 : i32
    return %c0_i32, %c0_i32_0 : i32, i32
  }
  func.func @transform_2(%arg0: i32) -> (i32, i32) {
    %c0_i32 = arith.constant 0 : i32
    %c0_i32_0 = arith.constant 0 : i32
    %c0_i32_1 = arith.constant 0 : i32
    return %c0_i32, %c0_i32_0 : i32, i32
  }
  func.func @transform_3(%arg0: i32) -> (i32, i32) {
    %c0_i32 = arith.constant 0 : i32
    %c0_i32_0 = arith.constant 0 : i32
    %c0_i32_1 = arith.constant 0 : i32
    return %c0_i32, %c0_i32_0 : i32, i32
  }
  func.func @transform_4(%arg0: i32) -> (i32, i32) {
    %c0_i32 = arith.constant 0 : i32
    %c0_i32_0 = arith.constant 0 : i32
    %c0_i32_1 = arith.constant 0 : i32
    return %c0_i32, %c0_i32_0 : i32, i32
  }
  func.func @transform_5(%arg0: i32) -> (i32, i32) {
    %c0_i32 = arith.constant 0 : i32
    %c0_i32_0 = arith.constant 0 : i32
    %c0_i32_1 = arith.constant 0 : i32
    return %c0_i32, %c0_i32_0 : i32, i32
  }
  func.func @transform_6(%arg0: i32) -> (i32, i32) {
    %c0_i32 = arith.constant 0 : i32
    %c0_i32_0 = arith.constant 0 : i32
    %c0_i32_1 = arith.constant 0 : i32
    return %c0_i32, %c0_i32_0 : i32, i32
  }
  func.func @transform_7(%arg0: i32) -> (i32, i32) {
    %c0_i32 = arith.constant 0 : i32
    %c0_i32_0 = arith.constant 0 : i32
    %c0_i32_1 = arith.constant 0 : i32
    return %c0_i32, %c0_i32_0 : i32, i32
  }
  func.func @transform_8(%arg0: i32) -> (i32, i32) {
    %c0_i32 = arith.constant 0 : i32
    %c0_i32_0 = arith.constant 0 : i32
    return %arg0, %c0_i32 : i32, i32
  }
  func.func @transform_9(%arg0: i32) -> (i32, i32) {
    %c0_i32 = arith.constant 0 : i32
    %c0_i32_0 = arith.constant 0 : i32
    return %arg0, %c0_i32 : i32, i32
  }
  func.func @transform_10(%arg0: i32) -> (i32, i32) {
    %c0_i32 = arith.constant 0 : i32
    %c0_i32_0 = arith.constant 0 : i32
    return %arg0, %c0_i32 : i32, i32
  }
  func.func @transform_11(%arg0: i32) -> (i32, i32, i32) {
    %c0_i32 = arith.constant 0 : i32
    %c0_i32_0 = arith.constant 0 : i32
    %c0_i32_1 = arith.constant 0 : i32
    return %arg0, %c0_i32, %c0_i32_0 : i32, i32, i32
  }
}

</mosaic_0001>

<bundles_post_ra>
// kernel: tpu_custom_call.1
= control target key start
LH: loop header
LB: loop body
LE: loop exit
PB: predicated region body
PF: predicated region fallthrough
CT: control target
= control target key end

     0   :  { %s969_s0 = inlined_call_operand.vmem [shape: bf16[8,128], index: 0, kind: input, shape index: {}]   ;;  %s970_s1 = inlined_call_operand.hbm [shape: bf16[128,128], index: 1, kind: input, shape index: {}]   ;;  %s971_s2 = inlined_call_operand.vmem [shape: f32[1,128], index: 2, kind: input, shape index: {}]   ;;  %s972_s3 = inlined_call_operand.hbm [shape: bf16[128,256], index: 3, kind: input, shape index: {}]   ;;  %s973_s4 = inlined_call_operand.hbm [shape: f32[1,256], index: 4, kind: input, shape index: {}]   ;;  %s974_s5 = inlined_call_operand.hbm [shape: f32[1,128], index: 5, kind: input, shape index: {}]   ;;  %s975_s6 = inlined_call_operand.<no memory space> [shape: f32[1,1], index: 6, kind: input, shape index: {}]   ;;  %s976_s7 = inlined_call_operand.vmem [shape: bf16[32,128], index: 7, kind: input, shape index: {}]   ;;  %s977_s8 = inlined_call_operand.hbm [shape: bf16[8,32], index: 8, kind: input, shape index: {}]   ;;  %s978_s9 = inlined_call_operand.vmem [shape: f32[8,1], index: 9, kind: input, shape index: {}]   ;;  %s979_s10 = inlined_call_operand.hbm [shape: f32[8,128], index: 10, kind: output, shape index: {0}]   ;;  %s980_s11 = inlined_call_operand.hbm [shape: f32[1,8,128], index: 11, kind: output, shape index: {1}]  }
   0x1   :  { %v17_v0 = vstv %s975_s6 }
   0x2   :  { %18 = vst [vmem:[#allocation2] sm:$0x1] %v17_v0 }
   0x3   :  { %19 = vsyncpa [#allocation4], 0 }
   0x4   :  { %20 = vsyncpa [#allocation7], 0 }
   0x5   :  { %21 = vsyncpa [#allocation10], 0 }
   0x6   :  { %22 = vsyncpa [#allocation5], 0 }
   0x7   :  { %23 = vsyncpa [#allocation14], 0  ;;  %s837_s19 = smov [#allocation6]  }
   0x8   :  { %s45_s20 = sshll.u32 %s837_s19, 4  ;;  %s46_s20 = int_to_ptr.vmem [resolvable:$true] %s45_s20 }
   0x9   :  { %s695_s21 = scalar_lea.vmem %s46_s20, 2048  ;;  %p700_p1 = scmp.lt.s32.totalorder %s46_s20, %s46_s20 }
   0xa   :  { %p696_p0 = scmp.ne.s32.totalorder %s46_s20, %s695_s21  ;;  %p701_p2 = scmp.lt.s32.totalorder %s695_s21, %s695_s21 }
   0xc   :  { %p702_p3 = por %p701_p2, %p700_p1 }
   0xe   :  { %p703_p4 = pnand %p702_p3, %p696_p0 }
  0x10   :  { %706 = shalt.err (!%p703_p4)
}
  0x11   :  { %s838_s22 = smov 128   ;;  %s839_s23 = smov 8  }
  0x12   :  { %51 = dma.hbm_to_vmem [thread:$0]  %s972_s3, 2048, %s46_s20, [#allocation7], %s838_s22, %s838_s22, %s839_s23  }
  0x13   :  { %s840_s25 = smov [#allocation9]   ;;  %s841_s27 = smov [#allocation3]  }
  0x14   :  { %s68_s26 = sshll.u32 %s840_s25, 4  ;;  %s31_s28 = sshll.u32 %s841_s27, 4  ;;  %s69_s26 = int_to_ptr.vmem [resolvable:$true] %s68_s26  ;;  %s32_s28 = int_to_ptr.vmem [resolvable:$true] %s31_s28 }
  0x15   :  { %s715_s29 = scalar_lea.vmem %s69_s26, 16  ;;  %s719_s30 = scalar_lea.vmem %s69_s26, 32 }
  0x16   :  { %p716_p5 = scmp.ne.s32.totalorder %s69_s26, %s715_s29  ;;  %p720_p6 = scmp.lt.s32.totalorder %s69_s26, %s69_s26 }
  0x17   :  { %p721_p7 = scmp.lt.s32.totalorder %s719_s30, %s715_s29 }
  0x19   :  { %p722_p8 = por %p721_p7, %p720_p6 }
  0x1b   :  { %p723_p9 = pnand %p722_p8, %p716_p5 }
  0x1d   :  { %726 = shalt.err (!%p723_p9)
}
  0x1e   :  { %71 = dma.hbm_to_vmem [thread:$0]  %s974_s5, 16, %s69_s26, [#allocation10]  }
  0x1f   :  { %s735_s14 = scalar_lea.vmem %s32_s28, 1024  ;;  %p740_p11 = scmp.lt.s32.totalorder %s32_s28, %s32_s28 }
  0x20   :  { %p736_p10 = scmp.ne.s32.totalorder %s32_s28, %s735_s14  ;;  %p741_p12 = scmp.lt.s32.totalorder %s735_s14, %s735_s14 }
  0x22   :  { %p742_p13 = por %p741_p12, %p740_p11 }
  0x24   :  { %p743_p0 = pnand %p742_p13, %p736_p10 }
  0x26   :  { %746 = shalt.err (!%p743_p0)
}
  0x27   :  { %s842_s3 = smov 64   ;;  %s843_s15 = smov 4  }
  0x28   :  { %37 = dma.hbm_to_vmem [thread:$0]  %s970_s1, 1024, %s32_s28, [#allocation4], %s842_s3, %s842_s3, %s843_s15  }
  0x29   :  { %s844_s18 = smov [#allocation8]   ;;  %s845_s20 = smov [#allocation11]  }
  0x2a   :  { %s58_s19 = sshll.u32 %s844_s18, 4  ;;  %s82_s21 = sshll.u32 %s845_s20, 4  ;;  %s59_s19 = int_to_ptr.vmem [resolvable:$true] %s58_s19  ;;  %s83_s21 = int_to_ptr.vmem [resolvable:$true] %s82_s21 }
  0x2b   :  { %s755_s5 = scalar_lea.vmem %s59_s19, 32  ;;  %p760_p2 = scmp.lt.s32.totalorder %s59_s19, %s59_s19 }
  0x2c   :  { %p756_p1 = scmp.ne.s32.totalorder %s59_s19, %s755_s5  ;;  %p761_p3 = scmp.lt.s32.totalorder %s755_s5, %s755_s5 }
  0x2e   :  { %p762_p4 = por %p761_p3, %p760_p2 }
  0x30   :  { %p763_p5 = pnand %p762_p4, %p756_p1 }
  0x32   :  { %766 = shalt.err (!%p763_p5)
}
  0x33   :  { %61 = dma.hbm_to_vmem [thread:$0]  %s973_s4, 32, %s59_s19, [#allocation7]  }
  0x34   :  { %s775_s24 = scalar_lea.vmem %s83_s21, 64  ;;  %p780_p7 = scmp.lt.s32.totalorder %s83_s21, %s83_s21 }
  0x35   :  { %p776_p6 = scmp.ne.s32.totalorder %s83_s21, %s775_s24  ;;  %p781_p8 = scmp.lt.s32.totalorder %s775_s24, %s775_s24 }
  0x37   :  { %p782_p9 = por %p781_p8, %p780_p7 }
  0x39   :  { %p783_p10 = pnand %p782_p9, %p776_p6 }
  0x3b   :  { %786 = shalt.err (!%p783_p10)
}
  0x3c   :  { %85 = dma.hbm_to_vmem [thread:$0]  %s977_s8, 64, %s83_s21, [#allocation10]  }
  0x3d   :  { %827 = dma.done.wait [#allocation4], 1024  }
  0x3e   :  { %828 = vsyncadd [#allocation4], 4294966272 }
  0x3f   :  { %829 = dma.done.wait [#allocation7], 2080  }
  0x40   :  { %830 = vsyncadd [#allocation7], 4294965216 }
  0x41   :  { %831 = dma.done.wait [#allocation10], 80  }
  0x42   :  { %832 = vsyncadd [#allocation10], 4294967216  ;;  %v846_v1 = vmov 0.0   ;;  %vm847_vm0 = vmmov 0   ;;  %v647_v2 = vld [vmem:[#allocation3 + $0x38] sm:$0xff]   ;;  %v648_v3 = vld [vmem:[#allocation3 + $0x30] sm:$0xff]   ;;  %v236_v43 = vlaneseq }
  0x43   :  { %599 = vmatprep.subr.bf16.mxu0 %v846_v1  ;;  %615 = vmatprep.mubr.msk.bf16.mxu0 %vm847_vm0, %v846_v1  ;;  %v649_v4 = vld [vmem:[#allocation3 + $0x28] sm:$0xff]   ;;  %v655_v5 = vld [vmem:[#allocation6 + $0x74] ss:$8 sps:$4 sm:$0xff]   ;;  %v657_v6 = vld [vmem:[#allocation6 + $0x70] ss:$8 sps:$4 sm:$0xff]   ;;  %v848_v27 = vmov 0  }
  0x44   :  { %600 = vmatpush3.bf16.msra.mxu0 %v647_v2  ;;  %v650_v7 = vld [vmem:[#allocation3 + $0x20] sm:$0xff]   ;;  %326 = vmatprep.subr.bf16.mxu1 %v655_v5  ;;  %v661_v10 = vld [vmem:[#allocation6 + $0x54] ss:$8 sps:$4 sm:$0xff]   ;;  %v663_v12 = vld [vmem:[#allocation6 + $0x50] ss:$8 sps:$4 sm:$0xff]   ;;  %vm400_vm1 = vcmask 261120  }
  0x45   :  { %601 = vmatprep.subr.bf16.mxu0 %v846_v1  ;;  %v658_v8 = vld [vmem:[#allocation6 + $0x64] ss:$8 sps:$4 sm:$0xff]   ;;  %327 = vmatpush1.bf16.msra.mxu1 %v657_v6  ;;  %v660_v9 = vld [vmem:[#allocation6 + $0x60] ss:$8 sps:$4 sm:$0xff]   ;;  %v651_v11 = vld [vmem:[#allocation3 + $0x18] sm:$0xff]   ;;  %v955_v44 = vshrl.u32 %v236_v43, 7 }
  0x46   :  { %328 = vmatprep.subr.bf16.mxu1 %v658_v8  ;;  %v652_v13 = vld [vmem:[#allocation3 + $0x10] sm:$0xff]   ;;  %v664_v14 = vld [vmem:[#allocation6 + $0x44] ss:$8 sps:$4 sm:$0xff]   ;;  %v666_v15 = vld [vmem:[#allocation6 + $0x40] ss:$8 sps:$4 sm:$0xff]   ;;  %358 = vmatprep.mubr.bf16.mxu1 %v848_v27  ;;  %vm492_vm4 = vcmask 7168  }
  0x47   :  { %v667_v16 = vld [vmem:[#allocation6 + $0x34] ss:$8 sps:$4 sm:$0xff]   ;;  %v653_v17 = vld [vmem:[#allocation3 + $0x8] sm:$0xff]   ;;  %v669_v18 = vld [vmem:[#allocation6 + $0x30] ss:$8 sps:$4 sm:$0xff]   ;;  %645 = vset.pattern.permute.xlu1 %v848_v27  ;;  %646 = vset.pattern.permute.xlu0 %v848_v27  ;;  %v242_v45 = vsub.s32 1, %v955_v44 }
  0x48   :  { %602 = vmatpush3.bf16.msra.mxu0 %v648_v3  ;;  %v670_v19 = vld [vmem:[#allocation6 + $0x24] ss:$8 sps:$4 sm:$0xff]   ;;  %v672_v21 = vld [vmem:[#allocation6 + $0x20] ss:$8 sps:$4 sm:$0xff]   ;;  %v673_v22 = vld [vmem:[#allocation6 + $0x14] ss:$8 sps:$4 sm:$0xff]  }
  0x49   :  { %603 = vmatprep.subr.bf16.mxu0 %v846_v1  ;;  %329 = vmatpush1.bf16.msra.mxu1 %v660_v9  ;;  %v654_v20 = vld [vmem:[#allocation3] sm:$0xff]   ;;  %v675_v24 = vld [vmem:[#allocation6 + $0x10] ss:$8 sps:$4 sm:$0xff]   ;;  %v555_v31 = vld [vmem:[%s971_s2] ss:$0 sm:$0xff]  ;;  %v238_v61 = vsub.s32 0, %v955_v44 }
  0x4a   :  { %330 = vmatprep.subr.bf16.mxu1 %v661_v10  ;;  %v104_v23 = vld [vmem:[%s969_s0] sm:$0xf]  ;;  %v676_v25 = vld [vmem:[#allocation6 + $0x4] ss:$8 sps:$4 sm:$0xff]   ;;  %s849_s30 = smov [#allocation12]  }
  0x4b   :  { %v678_v26 = vld [vmem:[#allocation6] ss:$8 sps:$4 sm:$0xff]   ;;  %v383_v30 = vld [vmem:[#allocation11] sm:$0xf]  ;;  %s530_s12 = sshll.u32 %s849_s30, 4  ;;  %s531_s12 = int_to_ptr.vmem [resolvable:$true] %s530_s12 }
  0x4c   :  { %604 = vmatpush3.bf16.msra.mxu0 %v649_v4  ;;  %v679_v28 = vld [vmem:[%s976_s7 + $0x8] sm:$0xff]   ;;  %v680_v29 = vld [vmem:[%s976_s7] sm:$0xff]   ;;  %s787_s13 = scalar_lea.vmem %s531_s12, 128  ;;  %p792_p12 = scmp.lt.s32.totalorder %s531_s12, %s531_s12 }
  0x4d   :  { %605 = vmatprep.subr.bf16.mxu0 %v846_v1  ;;  %331 = vmatpush1.bf16.msra.mxu1 %v663_v12  ;;  %v234_v46 = vld [vmem:[#allocation8] sm:$0x3]  ;;  %v584_v9 = vld [vmem:[#allocation9] ss:$0 sm:$0xff]  ;;  %p788_p11 = scmp.ne.s32.totalorder %s531_s12, %s787_s13  ;;  %p793_p13 = scmp.lt.s32.totalorder %s787_s13, %s787_s13 }
  0x4e   :  { %332 = vmatprep.subr.bf16.mxu1 %v664_v14  ;;  %v243_v47 = vrot.slane %v234_v46, %v242_v45  ;;  %v239_v2 = vrot.slane %v234_v46, %v238_v61 }
  0x4f   :  { %p794_p0 = por %p793_p13, %p792_p12 }
  0x50   :  { %606 = vmatpush3.bf16.msra.mxu0 %v650_v7 }
  0x51   :  { %607 = vmatprep.subr.bf16.mxu0 %v846_v1  ;;  %333 = vmatpush1.bf16.msra.mxu1 %v666_v15  ;;  %p795_p1 = pnand %p794_p0, %p788_p11 }
  0x52   :  { %334 = vmatprep.subr.bf16.mxu1 %v667_v16  ;;  %v465_v16 = vand.u32 127, %v236_v43 }
  0x54   :  { %608 = vmatpush3.bf16.msra.mxu0 %v651_v11  ;;  %vm476_vm3 = vcmp.lt.s32.totalorder %v465_v16, 32  ;;  %vm466_vm5 = vcmp.eq.s32.totalorder %v465_v16, 32 }
  0x55   :  { %609 = vmatprep.subr.bf16.mxu0 %v846_v1  ;;  %335 = vmatpush1.bf16.msra.mxu1 %v669_v18 }
  0x56   :  { %336 = vmatprep.subr.bf16.mxu1 %v670_v19 }
  0x58   :  { %610 = vmatpush3.bf16.msra.mxu0 %v652_v13 }
  0x59   :  { %611 = vmatprep.subr.bf16.mxu0 %v846_v1  ;;  %337 = vmatpush1.bf16.msra.mxu1 %v672_v21 }
  0x5a   :  { %338 = vmatprep.subr.bf16.mxu1 %v673_v22  ;;  %v585_v22 = vld [vmem:[#allocation2] ss:$0 sm:$0xff] }
  0x5c   :  { %612 = vmatpush3.bf16.msra.mxu0 %v653_v17 }
  0x5d   :  { %613 = vmatprep.subr.bf16.mxu0 %v846_v1  ;;  %339 = vmatpush1.bf16.msra.mxu1 %v675_v24 }
  0x5e   :  { %340 = vmatprep.subr.bf16.mxu1 %v676_v25 }
  0x60   :  { %614 = vmatpush3.bf16.msra.mxu0 %v654_v20 }
  0x61   :  { %619 = vmatprep.subr.bf16.mxu0 %v846_v1  ;;  %341 = vmatpush1.bf16.msra.mxu1 %v678_v26 }
  0x63   :  { %616 = vmatmul.mubr.bf16.vlgmr.msra.gmra.mxu0 %v104_v23  ;;  %v486_v23 = vld [vmem:[%s978_s9] sm:$0xff] }
  0x64   :  { %623 = vmatprep.mubr.msk.bf16.mxu0 %vm847_vm0, %v846_v1  ;;  %620 = vmatpush3.bf16.msra.mxu0 %v679_v28 }
  0x65   :  { %621 = vmatprep.subr.bf16.mxu0 %v846_v1 }
  0x68   :  { %622 = vmatpush3.bf16.msra.mxu0 %v680_v29 }
  0x6b   :  { %624 = vmatmul.mubr.msk.bf16.vlgmr.msra.gmra.mxu0 %vm400_vm1, %v383_v30 }
 0x123   :  { %v210_v32 = vpop.f32.mrf.mxu0 }
 0x124   :  { %v211_v33 = vadd.f32 %v555_v31, %v210_v32 }
 0x125   :  { %v617_v34 = vpop.f32.mrf.mxu0 }
 0x126   :  { %v216_v35 = vmax.f32 %v211_v33, 0.0 }
 0x127   :  { %v213_v36 = vpop.f32.mrf.mxu0 }
 0x128   :  { %v217_v37 = vpack.c.bf16 %v216_v35, %v216_v35 }
 0x129   :  { %v618_v38 = vpop.f32.mrf.mxu0 }
 0x12a   :  { %359 = vmatmul.mubr.bf16.vlgmr.msra.gmra.mxu1 %v217_v37 }
 0x12b   :  { %v438_v39 = vpop.f32.mrf.mxu0 }
 0x12d   :  { %v625_v40 = vpop.f32.mrf.mxu0 }
 0x12f   :  { %v441_v41 = vpop.f32.mrf.mxu0 }
 0x131   :  { %v626_v42 = vpop.f32.mrf.mxu0 }
 0x1ea   :  { %v360_v48 = vpop.f32.mrf.mxu1 }
 0x1eb   :  { %v361_v6 = vadd.f32 %v360_v48, %v239_v2 }
 0x1ec   :  { %v362_v49 = vpop.f32.mrf.mxu1 }
 0x1ed   :  { %v363_v50 = vadd.f32 %v362_v49, %v243_v47  ;;  %v478_v14 = vmul.f32 %v361_v6, %v361_v6 }
 0x1ee   :  { %v364_v51 = vpop.f32.mrf.mxu1 }
 0x1ef   :  { %v580_v52 = vadd.f32 -5.0, %v363_v50 }
 0x1f0   :  { %v365_v53 = vpop.f32.mrf.mxu1 }
 0x1f1   :  { %v369_v54 = vand.u32 2147483647, %v580_v52  ;;  %v368_v3 = vmax.f32 %v580_v52, 0.0 }
 0x1f3   :  { %v370_v55 = vsub.f32 0.0, %v369_v54 }
 0x1f5   :  { %v371_v56 = vmul.f32 1.442695, %v370_v55 }
 0x1f7   :  { %681 = vpow2.f32 %v371_v56 }
 0x204   :  { %v682_v57 = vpop.eup %681 }
 0x205   :  { %v373_v58 = vadd.f32 1.0, %v682_v57  ;;  %v376_v59 = vmul.f32 -0.5, %v682_v57  ;;  %v379_v62 = vand.u32 2147483647, %v682_v57 }
 0x207   :  { %683 = vlog2.f32 %v373_v58  ;;  %v377_v60 = vadd.f32 1.0, %v376_v59  ;;  %vm380_vm2 = vcmp.lt.f32.partialorder %v379_v62, 0.0004427343 }
 0x209   :  { %v378_v1 = vmul.f32 %v682_v57, %v377_v60 }
 0x214   :  { %v684_v63 = vpop.eup %683 }
 0x215   :  { %v375_v0 = vmul.f32 0.6931472, %v684_v63 }
 0x217   :  { %v381_v4 = vsel %vm380_vm2, %v378_v1, %v375_v0 }
 0x218   :  { %v382_v5 = vadd.f32 %v381_v4, %v368_v3 }
 0x21a   :  { %v444_v7 = vmul.f32 %v438_v39, %v382_v5  ;;  %v477_v8 = vmax.f32 %v382_v5, 1e-30  ;;  %v479_v12 = vmul.f32 %v382_v5, %v382_v5 }
 0x21c   :  { %v445_v10 = vadd.f32 %v444_v7, %v361_v6  ;;  %685 = vlog2.f32 %v477_v8  ;;  %v480_v17 = vadd.f32 %v479_v12, %v478_v14 }
 0x21e   :  { %v453_v11 = vmul.f32 %v584_v9, %v445_v10 }
 0x220   :  { %454 = vadd.xlane.f32.xlu0 %v453_v11 }
 0x229   :  { %v686_v13 = vpop.eup %685 }
 0x22a   :  { %v482_v15 = vmul.f32 0.6931472, %v686_v13 }
 0x22c   :  { %v483_v18 = vmul.f32 2.0, %v482_v15 }
 0x22e   :  { %v484_v19 = vsub.f32 %v480_v17, %v483_v18 }
 0x230   :  { %v586_v20 = vadd.f32 -1.0, %v484_v19 }
 0x232   :  { %v491_v21 = vsel %vm476_vm3, %v586_v20, 0.0 }
 0x233   :  { %503 = vadd.xlane.f32.xlu1 %v491_v21 }
 0x2a9   :  { %v455_v24 = vpop.xlane.xlu0 %454 }
 0x2aa   :  { %v463_v25 = vadd.f32 %v585_v22, %v455_v24 }
 0x2ac   :  { %v487_v26 = vsub.f32 %v463_v25, %v486_v23  ;;  %471 = vperm.xlu1 %645, %v463_v25  }
 0x2ae   :  { %v488_v27 = vand.u32 2147483647, %v487_v26 }
 0x2b0   :  { %v493_v28 = vsel %vm492_vm4, %v488_v27, 0.0 }
 0x2b1   :  { %494 = vadd.xlane.f32.xlu0 %v493_v28 }
 0x2bc   :  { %v504_v29 = vpop.xlane.xlu1 %503 }
 0x327   :  { %v472_v30 = vpop.permute.xlu1 %471 }
 0x328   :  { %v474_v31 = vsel %vm466_vm5, %v472_v30, %v445_v10 }
 0x329   :  { %475 = vst [vmem:[#allocation12] sm:$0xff] %v474_v31 }
 0x32a   :  { %798 = shalt.err (!%p795_p1)
}
 0x32b   :  { %533 = dma.vmem_to_hbm [thread:$0]  %s531_s12, 128, %s979_s10, [#allocation5]   ;;  %v505_v32 = vrot.slane %v504_v29, 4  ;;  %vm514_vm6 = vcmp.eq.s32.totalorder %v955_v44, 0  ;;  %vm517_vm7 = vcmp.eq.s32.totalorder %v465_v16, 1  ;;  %vm515_vm8 = vcmp.eq.s32.totalorder %v465_v16, 0 }
 0x32c   :  { %vm518_vm9 = vmand %vm514_vm6, %vm517_vm7  ;;  %s850_s3 = smov [#allocation13]  }
 0x32d   :  { %v506_v33 = vadd.f32 %v505_v32, %v504_v29  ;;  %s540_s15 = sshll.u32 %s850_s3, 4  ;;  %vm516_vm10 = vmand %vm514_vm6, %vm515_vm8  ;;  %s541_s15 = int_to_ptr.vmem [resolvable:$true] %s540_s15 }
 0x32e   :  { %s807_s17 = scalar_lea.vmem %s541_s15, 128  ;;  %p812_p3 = scmp.lt.s32.totalorder %s541_s15, %s541_s15 }
 0x32f   :  { %v507_v34 = vrot.slane %v506_v33, 2  ;;  %p808_p2 = scmp.ne.s32.totalorder %s541_s15, %s807_s17  ;;  %p813_p4 = scmp.lt.s32.totalorder %s807_s17, %s807_s17 }
 0x331   :  { %v508_v38 = vadd.f32 %v507_v34, %v506_v33  ;;  %p814_p5 = por %p813_p4, %p812_p3 }
 0x333   :  { %v509_v41 = vrot.slane %v508_v38, 1  ;;  %p815_p6 = pnand %p814_p5, %p808_p2 }
 0x335   :  { %v510_v45 = vadd.f32 %v509_v41, %v508_v38 }
 0x33a   :  { %v495_v35 = vpop.xlane.xlu0 %494 }
 0x33b   :  { %v496_v36 = vrot.slane %v495_v35, 4 }
 0x33d   :  { %v497_v37 = vadd.f32 %v496_v36, %v495_v35 }
 0x33f   :  { %v498_v39 = vrot.slane %v497_v37, 2 }
 0x341   :  { %v499_v40 = vadd.f32 %v498_v39, %v497_v37 }
 0x343   :  { %v500_v42 = vrot.slane %v499_v40, 1 }
 0x345   :  { %v501_v43 = vadd.f32 %v500_v42, %v499_v40 }
 0x347   :  { %627 = vpush %v501_v43 }
 0x348   :  { %629 = vpush %v510_v45 }
 0x378   :  { %s628_s10 = spop %627 }
 0x379   :  { %v521_v46 = vstv %s628_s10  ;;  %s630_s16 = spop %629 }
 0x37a   :  { %v519_v47 = vstv %s630_s16 }
 0x37b   :  { %v520_v48 = vsel %vm518_vm9, %v519_v47, 0.0 }
 0x37c   :  { %v522_v49 = vsel %vm516_vm10, %v521_v46, %v520_v48 }
 0x37d   :  { %523 = vst [vmem:[#allocation13] sm:$0xff] %v522_v49 }
 0x37e   :  { %818 = shalt.err (!%p815_p6)
}
 0x37f   :  { %543 = dma.vmem_to_hbm [thread:$0]  %s541_s15, 128, %s980_s11, [#allocation14]  }
 0x380   :  { %833 = dma.done.wait [#allocation5], 128  }
 0x381   :  { %834 = vsyncadd [#allocation5], 4294967168 }
 0x382   :  { %835 = dma.done.wait [#allocation14], 128  }
 0x383   :  { %836 = vsyncadd [#allocation14], 4294967168 }
 0x384   :  { %550 = vsyncpa [#allocation4], 1 }
 0x385   :  { %551 = vsyncpa [#allocation7], 1 }
 0x386   :  { %552 = vsyncpa [#allocation10], 1 }
 0x387   :  { %553 = vsyncpa [#allocation5], 1 }
 0x388   :  { %554 = vsyncpa [#allocation14], 1 }

</bundles_post_ra>
